<compile_context>
chip_gen: v5e
topology: v5e:2x2
jax: 0.10.0
libtpu: 0.0.40
codegen_flags: <defaults>
</compile_context>

<pallas_src>
import functools

import jax
import jax.numpy as jnp
import numpy as np
from jax import lax
from jax.experimental import pallas as pl
from jax.experimental.pallas import tpu as pltpu


def _softmax_last(x):
    m = jnp.max(x, axis=-1, keepdims=True)
    e = jnp.exp(x - m)
    return e * pl.reciprocal(jnp.sum(e, axis=-1, keepdims=True), approx=True)


def _softmax_axis0(x):
    m = jnp.max(x, axis=0, keepdims=True)
    e = jnp.exp(x - m)
    return e * pl.reciprocal(jnp.sum(e, axis=0, keepdims=True), approx=True)


def cross_view_attention_kernel(V, E, H, layout, vf_ref, ge_ref, slab_ref, o_ref):
    hd = E // H
    (L_INW, L_INB, L_OUTW, L_OUTB, L_DW1W, L_DW1B,
     L_DW2W, L_DW2B, L_AP1W, L_AP1B, L_AP2W, L_AP2B) = layout

    def ld(entry, bf16=False):
        off, r, c = entry          # static python ints -> static ref slice, no copies
        val = slab_ref[off:off + r, 0:c]
        return val.astype(jnp.bfloat16) if bf16 else val

    x = vf_ref[...]                # (V, E) f32
    ge = ge_ref[...]               # (1, E) f32
    xb = x.astype(jnp.bfloat16)

    # ---- nn.MultiheadAttention self-attention (unbatched, L = V) ----
    # 1/sqrt(hd) is pre-folded into the q columns of the packed in_proj weight + bias.
    qkv = jnp.dot(xb, ld(L_INW, True), preferred_element_type=jnp.float32) + ld(L_INB)
    q = qkv[:, 0:E].astype(jnp.bfloat16)        # cast once; per-head slices below reuse
    k = qkv[:, E:2 * E].astype(jnp.bfloat16)
    v = qkv[:, 2 * E:3 * E].astype(jnp.bfloat16)

    off_outw = L_OUTW[0]
    # Start the accumulator at the out_proj bias (saves one (V,E) add).
    attn = jnp.broadcast_to(ld(L_OUTB), (V, E)).astype(jnp.float32)
    for h in range(H):             # static unroll; heads fused into out_proj (no concat)
        lo = h * hd
        qh = q[:, lo:lo + hd]
        kh = k[:, lo:lo + hd]
        vh = v[:, lo:lo + hd]
        s = lax.dot_general(qh, kh, (((1,), (1,)), ((), ())),
                            preferred_element_type=jnp.float32)              # (V, V)
        p = _softmax_last(s)
        hv = jnp.dot(p.astype(jnp.bfloat16), vh,
                     preferred_element_type=jnp.float32)                      # (V, hd)
        w_out_h = slab_ref[off_outw + lo:off_outw + lo + hd, 0:E].astype(jnp.bfloat16)
        attn = attn + jnp.dot(hv.astype(jnp.bfloat16), w_out_h,
                              preferred_element_type=jnp.float32)             # (V, E)

    # ---- dynamic-weight MLP on global embedding (row form, lane-parallel) ----
    h1 = jnp.dot(ge.astype(jnp.bfloat16), ld(L_DW1W, True),
                 preferred_element_type=jnp.float32) + ld(L_DW1B)             # (1, E//2)
    h1 = jnp.maximum(h1, 0.0)
    logits = jnp.dot(h1.astype(jnp.bfloat16), ld(L_DW2W, True),
                     preferred_element_type=jnp.float32) + ld(L_DW2B)         # (1, V)
    w_row = _softmax_last(logits)                                             # (1, V)

    # (1, V) -> (V, 1) without an explicit transpose: diagonal-masked lane reduce.
    rid = lax.broadcasted_iota(jnp.int32, (V, V), 0)
    cid = lax.broadcasted_iota(jnp.int32, (V, V), 1)
    eye = (rid == cid).astype(jnp.float32)
    w_col = jnp.sum(w_row * eye, axis=1, keepdims=True)                       # (V, 1)

    # ---- detail weights: L2 norm over embed dim, softmax over views ----
    norms = jnp.sqrt(jnp.sum(x * x, axis=-1, keepdims=True))                  # (V, 1)
    detail = _softmax_axis0(norms)                                            # (V, 1)

    # torch: (V,E)+(V,1,E) -> (V,V,E) with identical leading slices; compute the 2-D
    # slice here, broadcast in the wrapper.
    combined = attn * (w_col * detail) + ge                                   # (V, E)

    # ---- additional processing MLP ----
    z = jnp.dot(combined.astype(jnp.bfloat16), ld(L_AP1W, True),
                preferred_element_type=jnp.float32) + ld(L_AP1B)
    z = jnp.maximum(z, 0.0)
    z = jnp.dot(z.astype(jnp.bfloat16), ld(L_AP2W, True),
                preferred_element_type=jnp.float32) + ld(L_AP2B)              # (V, E)

    o_ref[...] = z


def prepare_params(params, embed_dim, num_views, num_heads):
    """One-time (hoisted) prep: transpose, fold q-scale, pack everything into one slab."""
    E, V, H = embed_dim, num_views, num_heads
    assert E % H == 0, "embed_dim must be divisible by num_heads"
    assert E % 2 == 0, "embed_dim must be even (dynamic-weight hidden is E//2)"
    hd = E // H
    scale = jnp.float32(1.0 / np.sqrt(hd))

    in_w_t = params["in_proj_w"].T.astype(jnp.float32)            # (E, 3E)
    in_b = params["in_proj_b"].reshape(1, 3 * E).astype(jnp.float32)
    in_w_t = in_w_t.at[:, :E].multiply(scale)                     # fold 1/sqrt(hd) into q
    in_b = in_b.at[:, :E].multiply(scale)

    mats = [
        in_w_t,                                                   # (E, 3E)
        in_b,                                                     # (1, 3E)
        params["out_proj_w"].T,                                   # (E, E)
        params["out_proj_b"].reshape(1, E),
        params["dw1_w"].T,                                        # (E, E//2)
        params["dw1_b"].reshape(1, E // 2),
        params["dw2_w"].T,                                        # (E//2, V)
        params["dw2_b"].reshape(1, V),
        params["ap1_w"].T,                                        # (E, E)
        params["ap1_b"].reshape(1, E),
        params["ap2_w"].T,                                        # (E, E)
        params["ap2_b"].reshape(1, E),
    ]
    lanes = max(128, int(np.ceil(max(m.shape[1] for m in mats) / 128)) * 128)
    blocks, layout, off = [], [], 0
    for m in mats:
        r, c = m.shape
        rp = int(np.ceil(r / 8)) * 8                              # sublane-align each region
        blk = jnp.zeros((rp, lanes), jnp.float32).at[:r, :c].set(m.astype(jnp.float32))
        blocks.append(blk)
        layout.append((off, r, c))
        off += rp
    slab = jnp.concatenate(blocks, axis=0)                        # single f32 slab
    return slab, tuple(layout)


@functools.partial(jax.jit, static_argnames=("num_heads", "layout"))
def cross_view_attention(slab, layout, view_features, global_embedding, num_heads):
    V, E = view_features.shape
    ge_row = global_embedding.reshape(1, E).astype(jnp.float32)
    kernel = functools.partial(cross_view_attention_kernel, V, E, num_heads, layout)
    z = pl.pallas_call(
        kernel,
        out_shape=jax.ShapeDtypeStruct((V, E), jnp.float32),
        in_specs=[pl.BlockSpec(memory_space=pltpu.MemorySpace.VMEM)] * 3,
        out_specs=pl.BlockSpec(memory_space=pltpu.MemorySpace.VMEM),
    )(view_features.astype(jnp.float32), ge_row, slab)
    # torch broadcast: out[i, j, :] == z[j, :] for every i -> broadcast outside the kernel.
    return jnp.broadcast_to(z[None, :, :], (V, V, E))


def init_params(key, embed_dim, num_views):
    E = embed_dim
    ks = jax.random.split(key, 12)

    def u(k, shape, fan_in):
        s = 1.0 / np.sqrt(fan_in)
        return jax.random.uniform(k, shape, jnp.float32, -s, s)

    return {
        "in_proj_w": u(ks[0], (3 * E, E), E),
        "in_proj_b": jnp.zeros((3 * E,), jnp.float32),
        "out_proj_w": u(ks[1], (E, E), E),
        "out_proj_b": jnp.zeros((E,), jnp.float32),
        "dw1_w": u(ks[2], (E // 2, E), E),
        "dw1_b": u(ks[3], (E // 2,), E),
        "dw2_w": u(ks[4], (num_views, E // 2), E // 2),
        "dw2_b": u(ks[5], (num_views,), E // 2),
        "ap1_w": u(ks[6], (E, E), E),
        "ap1_b": u(ks[7], (E,), E),
        "ap2_w": u(ks[8], (E, E), E),
        "ap2_b": u(ks[9], (E,), E),
    }


def reference(params, vf, ge, num_heads):
    """Pure-JAX f32 mirror of the PyTorch forward (sanity check)."""
    V, E = vf.shape
    hd = E // num_heads
    qkv = vf @ params["in_proj_w"].T + params["in_proj_b"]
    q = qkv[:, :E] / np.sqrt(hd)
    k = qkv[:, E:2 * E]
    v = qkv[:, 2 * E:]
    heads = []
    for h in range(num_heads):
        s = q[:, h * hd:(h + 1) * hd] @ k[:, h * hd:(h + 1) * hd].T
        heads.append(jax.nn.softmax(s, axis=-1) @ v[:, h * hd:(h + 1) * hd])
    attn = jnp.concatenate(heads, -1) @ params["out_proj_w"].T + params["out_proj_b"]

    hidden = jnp.maximum(ge @ params["dw1_w"].T + params["dw1_b"], 0.0)
    w = jax.nn.softmax(hidden @ params["dw2_w"].T + params["dw2_b"], axis=-1)   # (V,)
    detail = jax.nn.softmax(jnp.linalg.norm(vf, axis=-1), axis=0)               # (V,)
    adaptive = w * detail

    weighted = attn * adaptive[:, None]                                          # (V, E)
    combined = weighted[None, :, :] + jnp.tile(ge[None, None, :], (V, 1, 1))     # (V, V, E)
    z = jnp.maximum(combined @ params["ap1_w"].T + params["ap1_b"], 0.0)
    z = z @ params["ap2_w"].T + params["ap2_b"]
    return z


if __name__ == "__main__":
    embed_dim, num_views, num_heads = 32, 8, 4
    key = jax.random.PRNGKey(0)
    kp, kv, kg = jax.random.split(key, 3)

    params = init_params(kp, embed_dim, num_views)
    view_features = jax.random.normal(kv, (num_views, embed_dim), jnp.float32)
    global_embedding = jax.random.normal(kg, (embed_dim,), jnp.float32)

    # One-time parameter prep (transposes, q-scale fold, single packed slab).
    slab, layout = prepare_params(params, embed_dim, num_views, num_heads)

    out = cross_view_attention(slab, layout, view_features, global_embedding, num_heads)
    out = jax.block_until_ready(out)

    ref = reference(params, view_features, global_embedding, num_heads)
    assert out.shape == (num_views, num_views, embed_dim)
    # Tolerance covers bf16 MXU operands + approx-reciprocal softmax; f32 accumulation
    # is kept everywhere.
    np.testing.assert_allclose(np.asarray(out), np.asarray(ref), rtol=3e-2, atol=3e-2)

    print("KERNEL_OK")
</pallas_src>

<mosaic_0001>
module attributes {stable_mosaic.version = 11 : i64} {
  func.func @cross_view_attention_kernel(%arg0: memref<8x32xf32, #tpu.memory_space<vmem>>, %arg1: memref<1x32xf32, #tpu.memory_space<vmem>>, %arg2: memref<224x128xf32, #tpu.memory_space<vmem>>, %arg3: memref<8x32xf32, #tpu.memory_space<vmem>>) attributes {dimension_semantics = [], scalar_prefetch = 0 : i64, scratch_operands = 0 : i64, tpu.core_type = #tpu.core_type<tc>} {
    %c0 = arith.constant 0 : index
    %c0_0 = arith.constant 0 : index
    %0 = vector.load %arg0[%c0, %c0_0] : memref<8x32xf32, #tpu.memory_space<vmem>>, vector<8x32xf32>
    %c0_1 = arith.constant 0 : index
    %c0_2 = arith.constant 0 : index
    %1 = vector.load %arg1[%c0_1, %c0_2] : memref<1x32xf32, #tpu.memory_space<vmem>>, vector<1x32xf32>
    %2 = arith.truncf %0 : vector<8x32xf32> to vector<8x32xbf16>
    %c0_3 = arith.constant 0 : index
    %c0_4 = arith.constant 0 : index
    %3 = vector.load %arg2[%c0_3, %c0_4] : memref<224x128xf32, #tpu.memory_space<vmem>>, vector<32x96xf32>
    %4 = arith.truncf %3 : vector<32x96xf32> to vector<32x96xbf16>
    %cst = arith.constant dense<0.000000e+00> : vector<8x96xf32>
    %5 = tpu.matmul %2, %4, %cst {dimension_numbers = #tpu.dot_dimension_numbers<[1], [0], [0], [1], [0, 0, 1, 1], [], []>} : vector<8x32xbf16>, vector<32x96xbf16>, vector<8x96xf32> -> vector<8x96xf32>
    %c32 = arith.constant 32 : index
    %c0_5 = arith.constant 0 : index
    %6 = vector.load %arg2[%c32, %c0_5] : memref<224x128xf32, #tpu.memory_space<vmem>>, vector<1x96xf32>
    %7 = vector.broadcast %6 : vector<1x96xf32> to vector<8x96xf32>
    %8 = arith.addf %5, %7 : vector<8x96xf32>
    %9 = vector.extract_strided_slice %8 {offsets = [0, 0], sizes = [8, 32], strides = [1, 1]} : vector<8x96xf32> to vector<8x32xf32>
    %10 = arith.truncf %9 : vector<8x32xf32> to vector<8x32xbf16>
    %11 = vector.extract_strided_slice %8 {offsets = [0, 32], sizes = [8, 32], strides = [1, 1]} : vector<8x96xf32> to vector<8x32xf32>
    %12 = arith.truncf %11 : vector<8x32xf32> to vector<8x32xbf16>
    %13 = vector.extract_strided_slice %8 {offsets = [0, 64], sizes = [8, 32], strides = [1, 1]} : vector<8x96xf32> to vector<8x32xf32>
    %14 = arith.truncf %13 : vector<8x32xf32> to vector<8x32xbf16>
    %c72 = arith.constant 72 : index
    %c0_6 = arith.constant 0 : index
    %15 = vector.load %arg2[%c72, %c0_6] : memref<224x128xf32, #tpu.memory_space<vmem>>, vector<1x32xf32>
    %16 = vector.shape_cast %15 : vector<1x32xf32> to vector<1x32xf32>
    %17 = vector.broadcast %16 : vector<1x32xf32> to vector<8x32xf32>
    %18 = vector.extract_strided_slice %10 {offsets = [0, 0], sizes = [8, 8], strides = [1, 1]} : vector<8x32xbf16> to vector<8x8xbf16>
    %19 = vector.extract_strided_slice %12 {offsets = [0, 0], sizes = [8, 8], strides = [1, 1]} : vector<8x32xbf16> to vector<8x8xbf16>
    %20 = vector.extract_strided_slice %14 {offsets = [0, 0], sizes = [8, 8], strides = [1, 1]} : vector<8x32xbf16> to vector<8x8xbf16>
    %cst_7 = arith.constant dense<0.000000e+00> : vector<8x8xf32>
    %21 = tpu.matmul %18, %19, %cst_7 {dimension_numbers = #tpu.dot_dimension_numbers<[1], [1], [0], [0], [0, 0, 1, 0], [], []>} : vector<8x8xbf16>, vector<8x8xbf16>, vector<8x8xf32> -> vector<8x8xf32>
    %cst_8 = arith.constant dense<0xFF800000> : vector<8xf32>
    %22 = vector.multi_reduction <maximumf>, %21, %cst_8 [1] : vector<8x8xf32> to vector<8xf32>
    %23 = vector.shape_cast %22 : vector<8xf32> to vector<8x1xf32>
    %24 = vector.broadcast %23 : vector<8x1xf32> to vector<8x8xf32>
    %25 = arith.subf %21, %24 : vector<8x8xf32>
    %26 = math.exp %25 : vector<8x8xf32>
    %cst_9 = arith.constant dense<0.000000e+00> : vector<8xf32>
    %27 = vector.multi_reduction <add>, %26, %cst_9 [1] : vector<8x8xf32> to vector<8xf32>
    %28 = vector.shape_cast %27 : vector<8xf32> to vector<8x1xf32>
    %29 = tpu.reciprocal %28 {approx = true} : vector<8x1xf32> -> vector<8x1xf32>
    %30 = vector.broadcast %29 : vector<8x1xf32> to vector<8x8xf32>
    %31 = arith.mulf %26, %30 : vector<8x8xf32>
    %32 = arith.truncf %31 : vector<8x8xf32> to vector<8x8xbf16>
    %cst_10 = arith.constant dense<0.000000e+00> : vector<8x8xf32>
    %33 = tpu.matmul %32, %20, %cst_10 {dimension_numbers = #tpu.dot_dimension_numbers<[1], [0], [0], [1], [0, 0, 1, 1], [], []>} : vector<8x8xbf16>, vector<8x8xbf16>, vector<8x8xf32> -> vector<8x8xf32>
    %c40 = arith.constant 40 : index
    %c0_11 = arith.constant 0 : index
    %34 = vector.load %arg2[%c40, %c0_11] : memref<224x128xf32, #tpu.memory_space<vmem>>, vector<8x32xf32>
    %35 = arith.truncf %34 : vector<8x32xf32> to vector<8x32xbf16>
    %36 = arith.truncf %33 : vector<8x8xf32> to vector<8x8xbf16>
    %cst_12 = arith.constant dense<0.000000e+00> : vector<8x32xf32>
    %37 = tpu.matmul %36, %35, %cst_12 {dimension_numbers = #tpu.dot_dimension_numbers<[1], [0], [0], [1], [0, 0, 1, 1], [], []>} : vector<8x8xbf16>, vector<8x32xbf16>, vector<8x32xf32> -> vector<8x32xf32>
    %38 = arith.addf %17, %37 : vector<8x32xf32>
    %39 = vector.extract_strided_slice %10 {offsets = [0, 8], sizes = [8, 8], strides = [1, 1]} : vector<8x32xbf16> to vector<8x8xbf16>
    %40 = vector.extract_strided_slice %12 {offsets = [0, 8], sizes = [8, 8], strides = [1, 1]} : vector<8x32xbf16> to vector<8x8xbf16>
    %41 = vector.extract_strided_slice %14 {offsets = [0, 8], sizes = [8, 8], strides = [1, 1]} : vector<8x32xbf16> to vector<8x8xbf16>
    %cst_13 = arith.constant dense<0.000000e+00> : vector<8x8xf32>
    %42 = tpu.matmul %39, %40, %cst_13 {dimension_numbers = #tpu.dot_dimension_numbers<[1], [1], [0], [0], [0, 0, 1, 0], [], []>} : vector<8x8xbf16>, vector<8x8xbf16>, vector<8x8xf32> -> vector<8x8xf32>
    %cst_14 = arith.constant dense<0xFF800000> : vector<8xf32>
    %43 = vector.multi_reduction <maximumf>, %42, %cst_14 [1] : vector<8x8xf32> to vector<8xf32>
    %44 = vector.shape_cast %43 : vector<8xf32> to vector<8x1xf32>
    %45 = vector.broadcast %44 : vector<8x1xf32> to vector<8x8xf32>
    %46 = arith.subf %42, %45 : vector<8x8xf32>
    %47 = math.exp %46 : vector<8x8xf32>
    %cst_15 = arith.constant dense<0.000000e+00> : vector<8xf32>
    %48 = vector.multi_reduction <add>, %47, %cst_15 [1] : vector<8x8xf32> to vector<8xf32>
    %49 = vector.shape_cast %48 : vector<8xf32> to vector<8x1xf32>
    %50 = tpu.reciprocal %49 {approx = true} : vector<8x1xf32> -> vector<8x1xf32>
    %51 = vector.broadcast %50 : vector<8x1xf32> to vector<8x8xf32>
    %52 = arith.mulf %47, %51 : vector<8x8xf32>
    %53 = arith.truncf %52 : vector<8x8xf32> to vector<8x8xbf16>
    %cst_16 = arith.constant dense<0.000000e+00> : vector<8x8xf32>
    %54 = tpu.matmul %53, %41, %cst_16 {dimension_numbers = #tpu.dot_dimension_numbers<[1], [0], [0], [1], [0, 0, 1, 1], [], []>} : vector<8x8xbf16>, vector<8x8xbf16>, vector<8x8xf32> -> vector<8x8xf32>
    %c48 = arith.constant 48 : index
    %c0_17 = arith.constant 0 : index
    %55 = vector.load %arg2[%c48, %c0_17] : memref<224x128xf32, #tpu.memory_space<vmem>>, vector<8x32xf32>
    %56 = arith.truncf %55 : vector<8x32xf32> to vector<8x32xbf16>
    %57 = arith.truncf %54 : vector<8x8xf32> to vector<8x8xbf16>
    %cst_18 = arith.constant dense<0.000000e+00> : vector<8x32xf32>
    %58 = tpu.matmul %57, %56, %cst_18 {dimension_numbers = #tpu.dot_dimension_numbers<[1], [0], [0], [1], [0, 0, 1, 1], [], []>} : vector<8x8xbf16>, vector<8x32xbf16>, vector<8x32xf32> -> vector<8x32xf32>
    %59 = arith.addf %38, %58 : vector<8x32xf32>
    %60 = vector.extract_strided_slice %10 {offsets = [0, 16], sizes = [8, 8], strides = [1, 1]} : vector<8x32xbf16> to vector<8x8xbf16>
    %61 = vector.extract_strided_slice %12 {offsets = [0, 16], sizes = [8, 8], strides = [1, 1]} : vector<8x32xbf16> to vector<8x8xbf16>
    %62 = vector.extract_strided_slice %14 {offsets = [0, 16], sizes = [8, 8], strides = [1, 1]} : vector<8x32xbf16> to vector<8x8xbf16>
    %cst_19 = arith.constant dense<0.000000e+00> : vector<8x8xf32>
    %63 = tpu.matmul %60, %61, %cst_19 {dimension_numbers = #tpu.dot_dimension_numbers<[1], [1], [0], [0], [0, 0, 1, 0], [], []>} : vector<8x8xbf16>, vector<8x8xbf16>, vector<8x8xf32> -> vector<8x8xf32>
    %cst_20 = arith.constant dense<0xFF800000> : vector<8xf32>
    %64 = vector.multi_reduction <maximumf>, %63, %cst_20 [1] : vector<8x8xf32> to vector<8xf32>
    %65 = vector.shape_cast %64 : vector<8xf32> to vector<8x1xf32>
    %66 = vector.broadcast %65 : vector<8x1xf32> to vector<8x8xf32>
    %67 = arith.subf %63, %66 : vector<8x8xf32>
    %68 = math.exp %67 : vector<8x8xf32>
    %cst_21 = arith.constant dense<0.000000e+00> : vector<8xf32>
    %69 = vector.multi_reduction <add>, %68, %cst_21 [1] : vector<8x8xf32> to vector<8xf32>
    %70 = vector.shape_cast %69 : vector<8xf32> to vector<8x1xf32>
    %71 = tpu.reciprocal %70 {approx = true} : vector<8x1xf32> -> vector<8x1xf32>
    %72 = vector.broadcast %71 : vector<8x1xf32> to vector<8x8xf32>
    %73 = arith.mulf %68, %72 : vector<8x8xf32>
    %74 = arith.truncf %73 : vector<8x8xf32> to vector<8x8xbf16>
    %cst_22 = arith.constant dense<0.000000e+00> : vector<8x8xf32>
    %75 = tpu.matmul %74, %62, %cst_22 {dimension_numbers = #tpu.dot_dimension_numbers<[1], [0], [0], [1], [0, 0, 1, 1], [], []>} : vector<8x8xbf16>, vector<8x8xbf16>, vector<8x8xf32> -> vector<8x8xf32>
    %c56 = arith.constant 56 : index
    %c0_23 = arith.constant 0 : index
    %76 = vector.load %arg2[%c56, %c0_23] : memref<224x128xf32, #tpu.memory_space<vmem>>, vector<8x32xf32>
    %77 = arith.truncf %76 : vector<8x32xf32> to vector<8x32xbf16>
    %78 = arith.truncf %75 : vector<8x8xf32> to vector<8x8xbf16>
    %cst_24 = arith.constant dense<0.000000e+00> : vector<8x32xf32>
    %79 = tpu.matmul %78, %77, %cst_24 {dimension_numbers = #tpu.dot_dimension_numbers<[1], [0], [0], [1], [0, 0, 1, 1], [], []>} : vector<8x8xbf16>, vector<8x32xbf16>, vector<8x32xf32> -> vector<8x32xf32>
    %80 = arith.addf %59, %79 : vector<8x32xf32>
    %81 = vector.extract_strided_slice %10 {offsets = [0, 24], sizes = [8, 8], strides = [1, 1]} : vector<8x32xbf16> to vector<8x8xbf16>
    %82 = vector.extract_strided_slice %12 {offsets = [0, 24], sizes = [8, 8], strides = [1, 1]} : vector<8x32xbf16> to vector<8x8xbf16>
    %83 = vector.extract_strided_slice %14 {offsets = [0, 24], sizes = [8, 8], strides = [1, 1]} : vector<8x32xbf16> to vector<8x8xbf16>
    %cst_25 = arith.constant dense<0.000000e+00> : vector<8x8xf32>
    %84 = tpu.matmul %81, %82, %cst_25 {dimension_numbers = #tpu.dot_dimension_numbers<[1], [1], [0], [0], [0, 0, 1, 0], [], []>} : vector<8x8xbf16>, vector<8x8xbf16>, vector<8x8xf32> -> vector<8x8xf32>
    %cst_26 = arith.constant dense<0xFF800000> : vector<8xf32>
    %85 = vector.multi_reduction <maximumf>, %84, %cst_26 [1] : vector<8x8xf32> to vector<8xf32>
    %86 = vector.shape_cast %85 : vector<8xf32> to vector<8x1xf32>
    %87 = vector.broadcast %86 : vector<8x1xf32> to vector<8x8xf32>
    %88 = arith.subf %84, %87 : vector<8x8xf32>
    %89 = math.exp %88 : vector<8x8xf32>
    %cst_27 = arith.constant dense<0.000000e+00> : vector<8xf32>
    %90 = vector.multi_reduction <add>, %89, %cst_27 [1] : vector<8x8xf32> to vector<8xf32>
    %91 = vector.shape_cast %90 : vector<8xf32> to vector<8x1xf32>
    %92 = tpu.reciprocal %91 {approx = true} : vector<8x1xf32> -> vector<8x1xf32>
    %93 = vector.broadcast %92 : vector<8x1xf32> to vector<8x8xf32>
    %94 = arith.mulf %89, %93 : vector<8x8xf32>
    %95 = arith.truncf %94 : vector<8x8xf32> to vector<8x8xbf16>
    %cst_28 = arith.constant dense<0.000000e+00> : vector<8x8xf32>
    %96 = tpu.matmul %95, %83, %cst_28 {dimension_numbers = #tpu.dot_dimension_numbers<[1], [0], [0], [1], [0, 0, 1, 1], [], []>} : vector<8x8xbf16>, vector<8x8xbf16>, vector<8x8xf32> -> vector<8x8xf32>
    %c64 = arith.constant 64 : index
    %c0_29 = arith.constant 0 : index
    %97 = vector.load %arg2[%c64, %c0_29] : memref<224x128xf32, #tpu.memory_space<vmem>>, vector<8x32xf32>
    %98 = arith.truncf %97 : vector<8x32xf32> to vector<8x32xbf16>
    %99 = arith.truncf %96 : vector<8x8xf32> to vector<8x8xbf16>
    %cst_30 = arith.constant dense<0.000000e+00> : vector<8x32xf32>
    %100 = tpu.matmul %99, %98, %cst_30 {dimension_numbers = #tpu.dot_dimension_numbers<[1], [0], [0], [1], [0, 0, 1, 1], [], []>} : vector<8x8xbf16>, vector<8x32xbf16>, vector<8x32xf32> -> vector<8x32xf32>
    %101 = arith.addf %80, %100 : vector<8x32xf32>
    %102 = arith.truncf %1 : vector<1x32xf32> to vector<1x32xbf16>
    %c80 = arith.constant 80 : index
    %c0_31 = arith.constant 0 : index
    %103 = vector.load %arg2[%c80, %c0_31] : memref<224x128xf32, #tpu.memory_space<vmem>>, vector<32x16xf32>
    %104 = arith.truncf %103 : vector<32x16xf32> to vector<32x16xbf16>
    %cst_32 = arith.constant dense<0.000000e+00> : vector<1x16xf32>
    %105 = tpu.matmul %102, %104, %cst_32 {dimension_numbers = #tpu.dot_dimension_numbers<[1], [0], [0], [1], [0, 0, 1, 1], [], []>} : vector<1x32xbf16>, vector<32x16xbf16>, vector<1x16xf32> -> vector<1x16xf32>
    %c112 = arith.constant 112 : index
    %c0_33 = arith.constant 0 : index
    %106 = vector.load %arg2[%c112, %c0_33] : memref<224x128xf32, #tpu.memory_space<vmem>>, vector<1x16xf32>
    %107 = arith.addf %105, %106 : vector<1x16xf32>
    %cst_34 = arith.constant 0.000000e+00 : f32
    %108 = vector.broadcast %cst_34 : f32 to vector<1x16xf32>
    %109 = arith.maximumf %107, %108 : vector<1x16xf32>
    %110 = arith.truncf %109 : vector<1x16xf32> to vector<1x16xbf16>
    %c120 = arith.constant 120 : index
    %c0_35 = arith.constant 0 : index
    %111 = vector.load %arg2[%c120, %c0_35] : memref<224x128xf32, #tpu.memory_space<vmem>>, vector<16x8xf32>
    %112 = arith.truncf %111 : vector<16x8xf32> to vector<16x8xbf16>
    %cst_36 = arith.constant dense<0.000000e+00> : vector<1x8xf32>
    %113 = tpu.matmul %110, %112, %cst_36 {dimension_numbers = #tpu.dot_dimension_numbers<[1], [0], [0], [1], [0, 0, 1, 1], [], []>} : vector<1x16xbf16>, vector<16x8xbf16>, vector<1x8xf32> -> vector<1x8xf32>
    %c136 = arith.constant 136 : index
    %c0_37 = arith.constant 0 : index
    %114 = vector.load %arg2[%c136, %c0_37] : memref<224x128xf32, #tpu.memory_space<vmem>>, vector<1x8xf32>
    %115 = arith.addf %113, %114 : vector<1x8xf32>
    %cst_38 = arith.constant dense<0xFF800000> : vector<1xf32>
    %116 = vector.multi_reduction <maximumf>, %115, %cst_38 [1] : vector<1x8xf32> to vector<1xf32>
    %117 = vector.shape_cast %116 : vector<1xf32> to vector<1x1xf32>
    %118 = vector.broadcast %117 : vector<1x1xf32> to vector<1x8xf32>
    %119 = arith.subf %115, %118 : vector<1x8xf32>
    %120 = math.exp %119 : vector<1x8xf32>
    %cst_39 = arith.constant dense<0.000000e+00> : vector<1xf32>
    %121 = vector.multi_reduction <add>, %120, %cst_39 [1] : vector<1x8xf32> to vector<1xf32>
    %122 = vector.shape_cast %121 : vector<1xf32> to vector<1x1xf32>
    %123 = tpu.reciprocal %122 {approx = true} : vector<1x1xf32> -> vector<1x1xf32>
    %124 = vector.broadcast %123 : vector<1x1xf32> to vector<1x8xf32>
    %125 = arith.mulf %120, %124 : vector<1x8xf32>
    %126 = tpu.iota {dimensions = array<i32: 0>} : vector<8x8xi32>
    %127 = tpu.iota {dimensions = array<i32: 1>} : vector<8x8xi32>
    %128 = arith.cmpi eq, %126, %127 : vector<8x8xi32>
    %129 = arith.extui %128 : vector<8x8xi1> to vector<8x8xi32>
    %130 = arith.sitofp %129 : vector<8x8xi32> to vector<8x8xf32>
    %131 = vector.broadcast %125 : vector<1x8xf32> to vector<8x8xf32>
    %132 = arith.mulf %131, %130 : vector<8x8xf32>
    %cst_40 = arith.constant dense<0.000000e+00> : vector<8xf32>
    %133 = vector.multi_reduction <add>, %132, %cst_40 [1] : vector<8x8xf32> to vector<8xf32>
    %134 = vector.shape_cast %133 : vector<8xf32> to vector<8x1xf32>
    %135 = arith.mulf %0, %0 : vector<8x32xf32>
    %cst_41 = arith.constant dense<0.000000e+00> : vector<8xf32>
    %136 = vector.multi_reduction <add>, %135, %cst_41 [1] : vector<8x32xf32> to vector<8xf32>
    %137 = vector.shape_cast %136 : vector<8xf32> to vector<8x1xf32>
    %138 = math.sqrt %137 : vector<8x1xf32>
    %cst_42 = arith.constant dense<0xFF800000> : vector<1xf32>
    %139 = vector.multi_reduction <maximumf>, %138, %cst_42 [0] : vector<8x1xf32> to vector<1xf32>
    %140 = vector.shape_cast %139 : vector<1xf32> to vector<1x1xf32>
    %141 = vector.broadcast %140 : vector<1x1xf32> to vector<8x1xf32>
    %142 = arith.subf %138, %141 : vector<8x1xf32>
    %143 = math.exp %142 : vector<8x1xf32>
    %cst_43 = arith.constant dense<0.000000e+00> : vector<1xf32>
    %144 = vector.multi_reduction <add>, %143, %cst_43 [0] : vector<8x1xf32> to vector<1xf32>
    %145 = vector.shape_cast %144 : vector<1xf32> to vector<1x1xf32>
    %146 = tpu.reciprocal %145 {approx = true} : vector<1x1xf32> -> vector<1x1xf32>
    %147 = vector.broadcast %146 : vector<1x1xf32> to vector<8x1xf32>
    %148 = arith.mulf %143, %147 : vector<8x1xf32>
    %149 = arith.mulf %134, %148 : vector<8x1xf32>
    %150 = vector.broadcast %149 : vector<8x1xf32> to vector<8x32xf32>
    %151 = arith.mulf %101, %150 : vector<8x32xf32>
    %152 = vector.broadcast %1 : vector<1x32xf32> to vector<8x32xf32>
    %153 = arith.addf %151, %152 : vector<8x32xf32>
    %154 = arith.truncf %153 : vector<8x32xf32> to vector<8x32xbf16>
    %c144 = arith.constant 144 : index
    %c0_44 = arith.constant 0 : index
    %155 = vector.load %arg2[%c144, %c0_44] : memref<224x128xf32, #tpu.memory_space<vmem>>, vector<32x32xf32>
    %156 = arith.truncf %155 : vector<32x32xf32> to vector<32x32xbf16>
    %cst_45 = arith.constant dense<0.000000e+00> : vector<8x32xf32>
    %157 = tpu.matmul %154, %156, %cst_45 {dimension_numbers = #tpu.dot_dimension_numbers<[1], [0], [0], [1], [0, 0, 1, 1], [], []>} : vector<8x32xbf16>, vector<32x32xbf16>, vector<8x32xf32> -> vector<8x32xf32>
    %c176 = arith.constant 176 : index
    %c0_46 = arith.constant 0 : index
    %158 = vector.load %arg2[%c176, %c0_46] : memref<224x128xf32, #tpu.memory_space<vmem>>, vector<1x32xf32>
    %159 = vector.broadcast %158 : vector<1x32xf32> to vector<8x32xf32>
    %160 = arith.addf %157, %159 : vector<8x32xf32>
    %cst_47 = arith.constant 0.000000e+00 : f32
    %161 = vector.broadcast %cst_47 : f32 to vector<8x32xf32>
    %162 = arith.maximumf %160, %161 : vector<8x32xf32>
    %163 = arith.truncf %162 : vector<8x32xf32> to vector<8x32xbf16>
    %c184 = arith.constant 184 : index
    %c0_48 = arith.constant 0 : index
    %164 = vector.load %arg2[%c184, %c0_48] : memref<224x128xf32, #tpu.memory_space<vmem>>, vector<32x32xf32>
    %165 = arith.truncf %164 : vector<32x32xf32> to vector<32x32xbf16>
    %cst_49 = arith.constant dense<0.000000e+00> : vector<8x32xf32>
    %166 = tpu.matmul %163, %165, %cst_49 {dimension_numbers = #tpu.dot_dimension_numbers<[1], [0], [0], [1], [0, 0, 1, 1], [], []>} : vector<8x32xbf16>, vector<32x32xbf16>, vector<8x32xf32> -> vector<8x32xf32>
    %c216 = arith.constant 216 : index
    %c0_50 = arith.constant 0 : index
    %167 = vector.load %arg2[%c216, %c0_50] : memref<224x128xf32, #tpu.memory_space<vmem>>, vector<1x32xf32>
    %168 = vector.broadcast %167 : vector<1x32xf32> to vector<8x32xf32>
    %169 = arith.addf %166, %168 : vector<8x32xf32>
    %c0_51 = arith.constant 0 : index
    %c0_52 = arith.constant 0 : index
    %170 = vector.load %arg3[%c0_51, %c0_52] : memref<8x32xf32, #tpu.memory_space<vmem>>, vector<8x32xf32>
    tpu.vector_store %arg3[%c0_51, %c0_52], %169 {strides = array<i32>} : memref<8x32xf32, #tpu.memory_space<vmem>>, vector<8x32xf32>,
    return
  }
}

</mosaic_0001>

<bundles_post_ra>
// kernel: cross_view_attention.1
= control target key start
LH: loop header
LB: loop body
LE: loop exit
PB: predicated region body
PF: predicated region fallthrough
CT: control target
= control target key end

     0   :  { %8 = vsyncpa [#allocation3], 0  ;;  %s794_s0 = inlined_call_operand.hbm [shape: f32[8,32], index: 0, kind: input, shape index: {}]   ;;  %s795_s1 = inlined_call_operand.vmem [shape: f32[1,32], index: 1, kind: input, shape index: {}]   ;;  %s796_s2 = inlined_call_operand.hbm [shape: f32[224,128], index: 2, kind: input, shape index: {}]   ;;  %s797_s3 = inlined_call_operand.vmem [shape: f32[8,32], index: 3, kind: output, shape index: {}]  }
   0x1   :  { %s15_s14 = sshll.u32 %s794_s0, 4  ;;  %s16_s14 = int_to_ptr.hbm [resolvable:$true] %s15_s14 }
   0x2   :  { %9 = vsyncpa [#allocation5], 0  ;;  %s680_s15 = smov [#allocation2]   ;;  %s27_s19 = sshll.u32 %s796_s2, 4  ;;  %s28_s19 = int_to_ptr.hbm [resolvable:$true] %s27_s19 }
   0x3   :  { %s17_s16 = sshll.u32 %s680_s15, 4  ;;  %s681_s20 = smov [#allocation4]   ;;  %s18_s16 = int_to_ptr.vmem [resolvable:$true] %s17_s16 }
   0x4   :  { %20 = dma.hbm_to_vmem [thread:$0]  %s16_s14, 128, %s18_s16, [#allocation3]  }
   0x5   :  { %s29_s21 = sshll.u32 %s681_s20, 4  ;;  %s682_s22 = smov 128   ;;  %s30_s21 = int_to_ptr.vmem [resolvable:$true] %s29_s21 }
   0x6   :  { %s683_s23 = smov 8  }
   0x7   :  { %35 = dma.hbm_to_vmem [thread:$0]  %s28_s19, 3584, %s30_s21, [#allocation5], %s682_s22, %s682_s22, %s683_s23  }
   0x8   :  { %676 = dma.done.wait [#allocation3], 128  }
   0x9   :  { %677 = vsyncadd [#allocation3], 4294967168 }
   0xa   :  { %678 = dma.done.wait [#allocation5], 3584  }
   0xb   :  { %679 = vsyncadd [#allocation5], 4294963712  ;;  %v50_v0 = vld [vmem:[#allocation4 + $0x10] sm:$0xff]  ;;  %v51_v1 = vld [vmem:[#allocation4 + $0x18] sm:$0xff]  ;;  %vm56_vm0 = vcmask 261120   ;;  %s684_s0 = smov 88  }
   0xc   :  { %v48_v2 = vld [vmem:[#allocation4] sm:$0xff]  ;;  %v53_v3 = vpack.c.bf16 %v51_v1, %v50_v0  ;;  %v49_v4 = vld [vmem:[#allocation4 + $0x8] sm:$0xff]  ;;  %v722_v6 = vld [vmem:[#allocation2] sm:$0xff]  ;;  %s685_s2 = smov 96   ;;  %s686_s24 = smov 120   ;;  %vm81_vm1 = vcmask 64512  }
   0xd   :  { %v52_v5 = vpack.c.bf16 %v49_v4, %v48_v2  ;;  %v47_v7 = vpack.c.bf16 %v722_v6, %v722_v6  ;;  %v597_v8 = vld [vmem:[#allocation4 + $0x20] ss:$0 sm:$0xff]  ;;  %s687_s25 = smov 80   ;;  %s688_s26 = smov 112   ;;  %v135_v28 = vld [vmem:[#allocation4 + $0x28] sm:$0xff]  ;;  %vm118_vm2 = vcmask 1043456  }
   0xe   :  { %66 = vmatpush.bf16.msra.mxu0 %v53_v3  ;;  %s689_s27 = smov 56   ;;  %s690_s28 = smov 40   ;;  %v136_v29 = vpack.c.bf16 %v135_v28, %v135_v28  ;;  %v214_v58 = vld [vmem:[#allocation4 + $0x30] sm:$0xff]  ;;  %vm425_vm3 = vcmask 130048   ;;  %vm442_vm4 = vcmask 57344  }
   0xf   :  { %s691_s29 = smov 64   ;;  %s692_s30 = smov 72   ;;  %v215_v59 = vpack.c.bf16 %v214_v58, %v214_v58 }
  0x10   :  { %v142_v30 = vsel %vm118_vm2, %v136_v29, 0  ;;  %s693_s4 = smov 48   ;;  %s694_s5 = smov 104  }
  0x11   :  { %151 = vmatpush.bf16.msra.mxu3 %v142_v30  ;;  %v221_v60 = vsel %vm118_vm2, %v215_v59, 0 }
  0x12   :  { %67 = vmatpush.bf16.msra.mxu0 %v52_v5 }
  0x15   :  { %563 = vmatmul.msk.bf16.vlgmr.msra.gmra.mxu0 %vm56_vm0, %v47_v7 }
  0x16   :  { %230 = vmatpush.bf16.msrb.mxu0 %v221_v60  ;;  %v424_v60 = vld [vmem:[#allocation4 + $0x88] sm:$0x1] }
  0x92   :  { %v69_v9 = vpop.f32.mrf.mxu0 }
  0x93   :  { %v70_v10 = vadd.f32 %v597_v8, %v69_v9 }
  0x95   :  { %v73_v11 = vpack.c.bf16 %v70_v10, %v70_v10 }
  0x97   :  { %v77_v12 = vunpack.c.l.b16 %v73_v11 }
  0x99   :  { %v727_v13 = vpack.c.b16 %v77_v12, %v77_v12 }
  0x9a   :  { %v71_v14 = vpop.f32.mrf.mxu0 }
  0x9b   :  { %160 = vrot.lane.b32.xlu2 %v727_v13, %s684_s0  ;;  %79 = vrot.lane.b32.xlu0 %v727_v13, %s685_s2 }
  0xa3   :  { %158 = vrot.lane.b32.xlu2 %v727_v13, %s686_s24 }
  0xab   :  { %239 = vrot.lane.b32.xlu2 %v727_v13, %s687_s25 }
  0xb3   :  { %237 = vrot.lane.b32.xlu2 %v727_v13, %s688_s26 }
  0xf5   :  { %v161_v15 = vpop.permute.xlu2 %160 }
  0xf6   :  { %v166_v46 = vsel %vm81_vm1, %v161_v15, 0 }
  0xfd   :  { %v159_v16 = vpop.permute.xlu2 %158 }
 0x105   :  { %v240_v17 = vpop.permute.xlu2 %239 }
 0x106   :  { %v245_v20 = vsel %vm81_vm1, %v240_v17, 0 }
 0x10d   :  { %v80_v18 = vpop.permute.xlu0 %79  ;;  %v238_v21 = vpop.permute.xlu2 %237 }
 0x10e   :  { %v86_v19 = vsel %vm81_vm1, %v80_v18, 0  ;;  %v293_v18 = vld [vmem:[#allocation4 + $0x38] sm:$0xff] }
 0x10f   :  { %95 = vmatpush.bf16.xpose.msra.mxu1 %v86_v19  ;;  %v294_v19 = vpack.c.bf16 %v293_v18, %v293_v18 }
 0x116   :  { %564 = vmatmul.msk.bf16.vlgmr.msra.gmra.mxu1 %vm81_vm1, %v73_v11 }
 0x117   :  { %254 = vmatpush.bf16.xpose.msrb.mxu1 %v245_v20  ;;  %v398_v20 = vld [vmem:[#allocation4 + $0x60] sm:$0xff] }
 0x126   :  { %570 = vmatmul.msk.bf16.vlgmr.msrb.gmra.mxu1 %vm81_vm1, %v238_v21  ;;  %v399_v21 = vld [vmem:[#allocation4 + $0x68] sm:$0xff] }
 0x193   :  { %v97_v22 = vpop.f32.mrf.mxu1 }
 0x194   :  { %v101_v23 = vsel %vm81_vm1, %v97_v22, -inf }
 0x195   :  { %102 = vmax.xlane.f32.xlu0 %v101_v23  ;;  %v401_v23 = vpack.c.bf16 %v399_v21, %v398_v20 }
 0x19b   :  { %v99_v24 = vpop.f32.mrf.mxu1 }
 0x19c   :  { %v397_v24 = vld [vmem:[#allocation4 + $0x58] sm:$0xff] }
 0x1a3   :  { %v256_v25 = vpop.f32.mrf.mxu1 }
 0x1a4   :  { %v260_v27 = vsel %vm81_vm1, %v256_v25, -inf }
 0x1a9   :  { %193 = vrot.lane.b32.xlu0 %v727_v13, %s689_s27 }
 0x1ab   :  { %v258_v26 = vpop.f32.mrf.mxu1 }
 0x1d3   :  { %261 = vmax.xlane.f32.xlu0 %v260_v27 }
 0x1e7   :  { %351 = vrot.lane.b32.xlu0 %v727_v13, %s690_s28 }
 0x208   :  { %v103_v31 = vpop.xlane.xlu0 %102 }
 0x209   :  { %v104_v32 = vsub.f32 %v97_v22, %v103_v31  ;;  %v396_v22 = vld [vmem:[#allocation4 + $0x50] sm:$0xff] }
 0x20b   :  { %v105_v33 = vmul.f32 1.442695, %v104_v32 }
 0x20d   :  { %602 = vpow2.f32 %v105_v33  ;;  %v46_v33 = vld [vmem:[%s795_s1] sm:$0x1] }
 0x213   :  { %v603_v34 = vpop.eup %602 }
 0x214   :  { %v107_v35 = vsel %vm81_vm1, %v603_v34, 0.0 }
 0x215   :  { %108 = vadd.xlane.f32.xlu1 %v107_v35  ;;  %v598_v35 = vld [vmem:[#allocation4 + $0x48] ss:$0 sm:$0xff] }
 0x21b   :  { %v194_v36 = vpop.permute.xlu0 %193 }
 0x21c   :  { %v199_v37 = vsel %vm118_vm2, %v194_v36, 0 }
 0x21d   :  { %208 = vmatpush.bf16.msrb.mxu3 %v199_v37 }
 0x22e   :  { %113 = vrot.lane.b32.xlu1 %v727_v13, %s691_s29 }
 0x246   :  { %v262_v38 = vpop.xlane.xlu0 %261 }
 0x247   :  { %v263_v50 = vsub.f32 %v256_v25, %v262_v38  ;;  %v400_v25 = vpack.c.bf16 %v397_v24, %v396_v22  ;;  %v695_v24 = vmov 0.0  }
 0x249   :  { %v264_v52 = vmul.f32 1.442695, %v263_v50 }
 0x259   :  { %v352_v39 = vpop.permute.xlu0 %351 }
 0x25a   :  { %v357_v40 = vsel %vm118_vm2, %v352_v39, 0 }
 0x25b   :  { %366 = vmatpush.bf16.msra.mxu1 %v357_v40  ;;  %v421_v40 = vld [vmem:[#allocation4 + $0x78] sm:$0xff] }
 0x288   :  { %v109_v41 = vpop.xlane.xlu1 %108 }
 0x289   :  { %604 = vrcp.f32 %v109_v41  ;;  %v422_v41 = vld [vmem:[#allocation4 + $0x80] sm:$0xff] }
 0x28a   :  { %606 = vpow2.f32 %v264_v52 }
 0x28f   :  { %v605_v42 = vpop.eup %604 }
 0x290   :  { %v111_v43 = vmul.f32 %v605_v42, %v603_v34  ;;  %v607_v55 = vpop.eup %606  ;;  %v395_v34 = vpack.c.bf16 %v46_v33, %v46_v33  ;;  %v423_v42 = vpack.c.bf16 %v422_v41, %v421_v40 }
 0x291   :  { %v266_v57 = vsel %vm81_vm1, %v607_v55, 0.0 }
 0x292   :  { %v112_v47 = vpack.c.bf16 %v111_v43, %v111_v43 }
 0x2a0   :  { %v114_v44 = vpop.permute.xlu1 %113 }
 0x2a1   :  { %v120_v45 = vsel %vm118_vm2, %v114_v44, 0 }
 0x2a2   :  { %129 = vmatpush.bf16.msra.mxu2 %v120_v45 }
 0x2a5   :  { %565 = vmatmul.msk.bf16.vlgmr.msra.gmra.mxu2 %vm81_vm1, %v112_v47 }
 0x2a6   :  { %175 = vmatpush.bf16.xpose.msrb.mxu2 %v166_v46 }
 0x2b5   :  { %567 = vmatmul.msk.bf16.vlgmr.msrb.gmra.mxu2 %vm81_vm1, %v159_v16 }
 0x328   :  { %v131_v48 = vpop.f32.mrf.mxu2 }
 0x329   :  { %v137_v49 = vpack.c.bf16 %v131_v48, %v131_v48 }
 0x32b   :  { %566 = vmatmul.msk.bf16.vlgmr.msra.gmra.mxu3 %vm81_vm1, %v137_v49  ;;  %v402_v49 = vld [vmem:[#allocation4 + $0x70] sm:$0x1] }
 0x330   :  { %v133_v51 = vpop.f32.mrf.mxu2 }
 0x338   :  { %v177_v53 = vpop.f32.mrf.mxu2 }
 0x339   :  { %v181_v54 = vsel %vm81_vm1, %v177_v53, -inf }
 0x33a   :  { %182 = vmax.xlane.f32.xlu2 %v181_v54 }
 0x340   :  { %v179_v56 = vpop.f32.mrf.mxu2 }
 0x342   :  { %267 = vadd.xlane.f32.xlu2 %v266_v57 }
 0x35a   :  { %318 = vrot.lane.b32.xlu2 %v727_v13, %s692_s30 }
 0x3ad   :  { %v183_v61 = vpop.xlane.xlu2 %182 }
 0x3ae   :  { %v184_v62 = vsub.f32 %v177_v53, %v183_v61  ;;  %v153_v63 = vpop.f32.mrf.mxu3 }
 0x3af   :  { %v157_v36 = vadd.f32 %v598_v35, %v153_v63 }
 0x3b0   :  { %v185_v0 = vmul.f32 1.442695, %v184_v62 }
 0x3b2   :  { %608 = vpow2.f32 %v185_v0 }
 0x3b5   :  { %v268_v1 = vpop.xlane.xlu2 %267 }
 0x3b6   :  { %v155_v2 = vpop.f32.mrf.mxu3 }
 0x3b8   :  { %v609_v3 = vpop.eup %608 }
 0x3b9   :  { %v187_v4 = vsel %vm81_vm1, %v609_v3, 0.0 }
 0x3ba   :  { %188 = vadd.xlane.f32.xlu1 %v187_v4 }
 0x3bd   :  { %v319_v5 = vpop.permute.xlu2 %318 }
 0x3be   :  { %v324_v7 = vsel %vm81_vm1, %v319_v5, 0  ;;  %v466_v5 = vmul.f32 %v722_v6, %v722_v6 }
 0x3bf   :  { %333 = vmatpush.bf16.xpose.msra.mxu0 %v324_v7 }
 0x3c0   :  { %v467_v7 = vsel %vm56_vm0, %v466_v5, 0.0 }
 0x3d3   :  { %272 = vrot.lane.b32.xlu1 %v727_v13, %s693_s4 }
 0x3db   :  { %316 = vrot.lane.b32.xlu1 %v727_v13, %s694_s5  ;;  %v300_v13 = vsel %vm118_vm2, %v294_v19, 0  ;;  %v454_v19 = vlaneseq }
 0x3dc   :  { %309 = vmatpush.bf16.msra.mxu3 %v300_v13 }
 0x3dd   :  { %v455_v20 = vshrl.u32 %v454_v19, 7  ;;  %v457_v21 = vand.u32 127, %v454_v19 }
 0x3df   :  { %vm458_vm5 = vcmp.eq.s32.totalorder %v455_v20, %v457_v21  ;;  %v601_v20 = vld [vmem:[#allocation4 + $0xd8] ss:$0 sm:$0xff] }
 0x42d   :  { %v189_v8 = vpop.xlane.xlu1 %188 }
 0x42e   :  { %610 = vrcp.f32 %v189_v8 }
 0x42f   :  { %612 = vrcp.f32 %v268_v1 }
 0x434   :  { %v611_v9 = vpop.eup %610 }
 0x435   :  { %v191_v10 = vmul.f32 %v611_v9, %v609_v3  ;;  %v613_v12 = vpop.eup %612 }
 0x436   :  { %v270_v14 = vmul.f32 %v613_v12, %v607_v55 }
 0x437   :  { %v192_v11 = vpack.c.bf16 %v191_v10, %v191_v10 }
 0x438   :  { %v271_v17 = vpack.c.bf16 %v270_v14, %v270_v14  ;;  %v372_v14 = vld [vmem:[#allocation4 + $0x40] sm:$0xff] }
 0x439   :  { %568 = vmatmul.msk.bf16.vlgmr.msrb.gmra.mxu3 %vm81_vm1, %v192_v11 }
 0x43a   :  { %412 = vmatpush.bf16.msrb.mxu3 %v401_v23 }
 0x43e   :  { %413 = vmatpush.bf16.msrb.mxu3 %v400_v25  ;;  %v578_v25 = vsel %vm458_vm5, 1.0, %v695_v24 }
 0x445   :  { %v273_v15 = vpop.permute.xlu1 %272 }
 0x446   :  { %v278_v16 = vsel %vm118_vm2, %v273_v15, 0  ;;  %v373_v15 = vpack.c.bf16 %v372_v14, %v372_v14  ;;  %v532_v14 = vld [vmem:[#allocation4 + $0xb8] sm:$0xff] }
 0x447   :  { %287 = vmatpush.bf16.msra.mxu2 %v278_v16 }
 0x448   :  { %v379_v16 = vsel %vm118_vm2, %v373_v15, 0  ;;  %v533_v15 = vld [vmem:[#allocation4 + $0xc0] sm:$0xff] }
 0x44a   :  { %571 = vmatmul.msk.bf16.vlgmr.msra.gmra.mxu2 %vm81_vm1, %v271_v17 }
 0x44b   :  { %388 = vmatpush.bf16.msrb.mxu2 %v379_v16  ;;  %v536_v16 = vpack.c.bf16 %v533_v15, %v532_v14 }
 0x44d   :  { %v317_v30 = vpop.permute.xlu1 %316 }
 0x4bc   :  { %v210_v26 = vpop.f32.mrf.mxu3 }
 0x4bd   :  { %v216_v27 = vpack.c.bf16 %v210_v26, %v210_v26 }
 0x4bf   :  { %569 = vmatmul.msk.bf16.vlgmr.msrb.gmra.mxu0 %vm81_vm1, %v216_v27 }
 0x4c0   :  { %436 = vmatpush.bf16.msrb.mxu0 %v423_v42 }
 0x4c4   :  { %v212_v28 = vpop.f32.mrf.mxu3 }
 0x4cd   :  { %v289_v29 = vpop.f32.mrf.mxu2 }
 0x4ce   :  { %v295_v31 = vpack.c.bf16 %v289_v29, %v289_v29 }
 0x4cf   :  { %573 = vmatmul.msk.bf16.vlgmr.msra.gmra.mxu0 %vm81_vm1, %v317_v30 }
 0x4d0   :  { %572 = vmatmul.msk.bf16.vlgmr.msra.gmra.mxu3 %vm81_vm1, %v295_v31 }
 0x4d5   :  { %v291_v32 = vpop.f32.mrf.mxu2 }
 0x4e0   :  { %576 = vmatmul.msk.bf16.vlgmr.msrb.gmra.mxu3 %vm56_vm0, %v395_v34 }
 0x53c   :  { %v232_v37 = vpop.f32.mrf.mxu0 }
 0x53d   :  { %v236_v38 = vadd.f32 %v232_v37, %v157_v36 }
 0x544   :  { %v234_v39 = vpop.f32.mrf.mxu0 }
 0x54c   :  { %v335_v43 = vpop.f32.mrf.mxu0 }
 0x54d   :  { %v339_v44 = vsel %vm81_vm1, %v335_v43, -inf }
 0x54e   :  { %340 = vmax.xlane.f32.xlu2 %v339_v44 }
 0x553   :  { %v311_v45 = vpop.f32.mrf.mxu3 }
 0x554   :  { %v772_v46 = vadd.f32 %v311_v45, %v236_v38  ;;  %v337_v47 = vpop.f32.mrf.mxu0 }
 0x556   :  { %468 = vadd.xlane.f32.xlu2 %v467_v7 }
 0x55b   :  { %v313_v48 = vpop.f32.mrf.mxu3 }
 0x563   :  { %v415_v50 = vpop.f32.mrf.mxu3 }
 0x564   :  { %v416_v51 = vadd.f32 %v415_v50, %v402_v49 }
 0x566   :  { %v419_v52 = vmax.f32 %v416_v51, 0.0  ;;  %v508_v51 = vld [vmem:[#allocation4 + $0xa0] sm:$0xff] }
 0x568   :  { %v420_v53 = vpack.c.bf16 %v419_v52, %v419_v52  ;;  %v509_v52 = vld [vmem:[#allocation4 + $0xa8] sm:$0xff] }
 0x56a   :  { %577 = vmatmul.msk.bf16.vlgmr.msrb.gmra.mxu0 %vm425_vm3, %v420_v53  ;;  %v511_v53 = vpack.c.bf16 %v509_v52, %v508_v51 }
 0x56b   :  { %v417_v54 = vpop.f32.mrf.mxu3 }
 0x56c   :  { %523 = vmatpush.bf16.msrb.mxu1 %v511_v53 }
 0x5c1   :  { %v341_v55 = vpop.xlane.xlu2 %340 }
 0x5c2   :  { %v342_v56 = vsub.f32 %v335_v43, %v341_v55  ;;  %v506_v55 = vld [vmem:[#allocation4 + $0x90] sm:$0xff] }
 0x5c4   :  { %v343_v57 = vmul.f32 1.442695, %v342_v56  ;;  %v507_v56 = vld [vmem:[#allocation4 + $0x98] sm:$0xff] }
 0x5c6   :  { %614 = vpow2.f32 %v343_v57  ;;  %v510_v57 = vpack.c.bf16 %v507_v56, %v506_v55 }
 0x5c8   :  { %524 = vmatpush.bf16.msrb.mxu1 %v510_v57 }
 0x5c9   :  { %v469_v28 = vpop.xlane.xlu2 %468 }
 0x5ca   :  { %vm477_vm6 = vcmp.eq.f32.partialorder %v469_v28, inf  ;;  %v480_v37 = vand.u32 2147483648, %v469_v28  ;;  %vm479_vm7 = vcmp.eq.f32.partialorder %v469_v28, 0.0 }
 0x5cc   :  { %v615_v58 = vpop.eup %614 }
 0x5cd   :  { %v345_v59 = vsel %vm81_vm1, %v615_v58, 0.0 }
 0x5ce   :  { %346 = vadd.xlane.f32.xlu1 %v345_v59 }
 0x5e7   :  { %v438_v61 = vpop.f32.mrf.mxu0 }
 0x5e8   :  { %v439_v62 = vadd.f32 %v438_v61, %v424_v60 }
 0x5ea   :  { %v443_v63 = vsel %vm442_vm4, %v439_v62, -inf }
 0x5eb   :  { %444 = vmax.xlane.f32.xlu0 %v443_v63 }
 0x5ef   :  { %v440_v0 = vpop.f32.mrf.mxu0 }
 0x641   :  { %v347_v1 = vpop.xlane.xlu1 %346 }
 0x642   :  { %616 = vrcp.f32 %v347_v1 }
 0x648   :  { %v617_v2 = vpop.eup %616 }
 0x649   :  { %v349_v3 = vmul.f32 %v617_v2, %v615_v58 }
 0x64b   :  { %v350_v4 = vpack.c.bf16 %v349_v3, %v349_v3 }
 0x64d   :  { %574 = vmatmul.msk.bf16.vlgmr.msra.gmra.mxu1 %vm81_vm1, %v350_v4  ;;  %v599_v4 = vld [vmem:[%s795_s1] ss:$0 sm:$0xff] }
 0x65e   :  { %v445_v8 = vpop.xlane.xlu0 %444 }
 0x65f   :  { %v446_v9 = vsub.f32 %v439_v62, %v445_v8 }
 0x661   :  { %v447_v10 = vmul.f32 1.442695, %v446_v9 }
 0x663   :  { %618 = vpow2.f32 %v447_v10  ;;  %v534_v10 = vld [vmem:[#allocation4 + $0xc8] sm:$0xff] }
 0x669   :  { %v619_v11 = vpop.eup %618 }
 0x66a   :  { %v449_v12 = vsel %vm442_vm4, %v619_v11, 0.0 }
 0x66b   :  { %450 = vadd.xlane.f32.xlu1 %v449_v12 }
 0x6ca   :  { %v368_v17 = vpop.f32.mrf.mxu1 }
 0x6cb   :  { %v374_v6 = vpack.c.bf16 %v368_v17, %v368_v17  ;;  %v600_v17 = vld [vmem:[#allocation4 + $0xb0] ss:$0 sm:$0xff] }
 0x6cd   :  { %575 = vmatmul.msk.bf16.vlgmr.msrb.gmra.mxu2 %vm81_vm1, %v374_v6 }
 0x6d2   :  { %v370_v18 = vpop.f32.mrf.mxu1 }
 0x6de   :  { %v451_v13 = vpop.xlane.xlu1 %450 }
 0x6df   :  { %620 = vrcp.f32 %v451_v13 }
 0x6e0   :  { %622 = vrsqrt.f32 %v469_v28 }
 0x6e5   :  { %v621_v22 = vpop.eup %620 }
 0x6e6   :  { %v453_v23 = vmul.f32 %v621_v22, %v619_v11  ;;  %v623_v30 = vpop.eup %622  ;;  %v535_v11 = vld [vmem:[#allocation4 + $0xd0] sm:$0xff] }
 0x6e7   :  { %v471_v31 = vmul.f32 %v623_v30, %v469_v28  ;;  %v537_v12 = vpack.c.bf16 %v535_v11, %v534_v10 }
 0x6e8   :  { %v461_v26 = vperm.slane %v453_v23, 0 }
 0x6e9   :  { %v472_v32 = vmul.f32 %v623_v30, %v471_v31  ;;  %549 = vmatpush.bf16.msra.mxu2 %v537_v12 }
 0x6ea   :  { %v462_v27 = vmul.f32 %v578_v25, %v461_v26 }
 0x6eb   :  { %v473_v33 = vmul.f32 0.5, %v472_v32 }
 0x6ec   :  { %v463_v29 = vsel %vm81_vm1, %v462_v27, 0.0 }
 0x6ed   :  { %464 = vadd.xlane.f32.xlu2 %v463_v29  ;;  %v474_v34 = vsub.f32 1.5, %v473_v33  ;;  %550 = vmatpush.bf16.msra.mxu2 %v536_v16 }
 0x6ef   :  { %v475_v35 = vmul.f32 %v623_v30, %v474_v34 }
 0x6f1   :  { %v476_v36 = vmul.f32 %v475_v35, %v469_v28 }
 0x6f3   :  { %v478_v38 = vsel %vm477_vm6, %v469_v28, %v476_v36 }
 0x6f4   :  { %v481_v39 = vsel %vm479_vm7, %v480_v37, %v478_v38 }
 0x6f5   :  { %v482_v40 = vrot.slane %v481_v39, 4 }
 0x6f7   :  { %v483_v41 = vmax.f32 %v481_v39, %v482_v40 }
 0x6f9   :  { %v484_v42 = vrot.slane %v483_v41, 2 }
 0x6fb   :  { %v485_v43 = vmax.f32 %v483_v41, %v484_v42 }
 0x6fd   :  { %v486_v44 = vrot.slane %v485_v43, 1 }
 0x6ff   :  { %v487_v45 = vmax.f32 %v485_v43, %v486_v44 }
 0x701   :  { %v488_v47 = vsub.f32 %v481_v39, %v487_v45 }
 0x703   :  { %v489_v48 = vmul.f32 1.442695, %v488_v47 }
 0x705   :  { %624 = vpow2.f32 %v489_v48 }
 0x70b   :  { %v625_v49 = vpop.eup %624 }
 0x70c   :  { %v491_v50 = vrot.slane %v625_v49, 4 }
 0x70e   :  { %v492_v54 = vadd.f32 %v625_v49, %v491_v50 }
 0x710   :  { %v493_v58 = vrot.slane %v492_v54, 2 }
 0x712   :  { %v494_v59 = vadd.f32 %v493_v58, %v492_v54 }
 0x714   :  { %v495_v60 = vrot.slane %v494_v59, 1 }
 0x716   :  { %v496_v62 = vadd.f32 %v495_v60, %v494_v59 }
 0x718   :  { %626 = vrcp.f32 %v496_v62 }
 0x71e   :  { %v627_v0 = vpop.eup %626 }
 0x71f   :  { %v498_v1 = vmul.f32 %v627_v0, %v625_v49 }
 0x750   :  { %v390_v61 = vpop.f32.mrf.mxu2 }
 0x751   :  { %v394_v3 = vadd.f32 %v390_v61, %v772_v46 }
 0x758   :  { %v392_v63 = vpop.f32.mrf.mxu2 }
 0x760   :  { %v465_v2 = vpop.xlane.xlu2 %464 }
 0x761   :  { %v499_v5 = vmul.f32 %v498_v1, %v465_v2 }
 0x763   :  { %v500_v7 = vmul.f32 %v499_v5, %v394_v3 }
 0x765   :  { %v504_v8 = vadd.f32 %v599_v4, %v500_v7 }
 0x767   :  { %v505_v9 = vpack.c.bf16 %v504_v8, %v504_v8 }
 0x769   :  { %579 = vmatmul.msk.bf16.vlgmr.msrb.gmra.mxu1 %vm56_vm0, %v505_v9 }
 0x7e6   :  { %v526_v46 = vpop.f32.mrf.mxu1 }
 0x7e7   :  { %v527_v6 = vadd.f32 %v600_v17, %v526_v46 }
 0x7e9   :  { %v530_v18 = vmax.f32 %v527_v6, 0.0 }
 0x7eb   :  { %v531_v19 = vpack.c.bf16 %v530_v18, %v530_v18 }
 0x7ed   :  { %580 = vmatmul.msk.bf16.vlgmr.msra.gmra.mxu2 %vm56_vm0, %v531_v19 }
 0x7ee   :  { %v528_v13 = vpop.f32.mrf.mxu1 }
 0x870   :  { %v552_v21 = vpop.f32.mrf.mxu2 }
 0x871   :  { %v553_v22 = vadd.f32 %v601_v20, %v552_v21 }
 0x873   :  { %556 = vst.msk [vmem:[%s797_s3] sm:$0xff] %vm56_vm0, %v553_v22 }
 0x878   :  { %v554_v23 = vpop.f32.mrf.mxu2 }
 0x879   :  { %561 = vsyncpa [#allocation3], 1 }
 0x87a   :  { %562 = vsyncpa [#allocation5], 1 }

</bundles_post_ra>
